<compile_context>
chip_gen: v7x
topology: tpu7x:2x2x1
jax: 0.10.0
libtpu: 0.0.40
codegen_flags: <defaults>
</compile_context>

<pallas_src>
import jax
import jax.numpy as jnp
from jax.experimental import pallas as pl
from jax.experimental.pallas import tpu as pltpu


def _round_up(x, m):
    return ((x + m - 1) // m) * m


def _reglu_kernel(x_ref, wab_ref, bab_ref, wc_ref, bc_ref, o_ref):
    # x_ref:   (1, C, T)        tokens on the lane axis
    # wab_ref: (2*hidden, C)    fused [Wa; Wb]
    # bab_ref: (2*hidden, 1)    fused [ba; bb] (f32)
    # wc_ref:  (C, hidden)
    # bc_ref:  (C, 1)           (f32)
    # o_ref:   (1, C, T)
    x = x_ref[0]                                              # (C, T)

    # Single fused first-stage matmul on the MXU, f32 accumulation.
    ab = jnp.dot(wab_ref[...], x, preferred_element_type=jnp.float32)
    ab = ab + bab_ref[...]                                    # (2H, T) f32

    hidden = wab_ref.shape[0] // 2
    a = ab[:hidden, :]
    b = ab[hidden:, :]

    # ReGLU gate in f32 on the VPU (safe on v5e: no bf16 VALU there).
    h = a * jnp.maximum(b, 0.0)                               # (H, T) f32

    # Second matmul; feed operands in the weight dtype for MXU throughput.
    y = jnp.dot(wc_ref[...], h.astype(wc_ref.dtype),
                preferred_element_type=jnp.float32)
    y = y + bc_ref[...]                                       # (C, T) f32

    o_ref[0] = y.astype(o_ref.dtype)


def reglu_forward(x_nchw, wa, ba, wb, bb, wc, bc, *,
                  tile_tokens=1024, weight_dtype=None):
    """x_nchw: (N, C, H, W). Conv weights are PyTorch-shaped:
       wa, wb: (C*ffn_mul, C, 1, 1); wc: (C, C*ffn_mul, 1, 1); biases 1-D.
       weight_dtype: optional compute dtype for x / weights (e.g. bf16)."""
    N, C, H, W = x_nchw.shape
    hidden = wa.shape[0]
    HW = H * W
    out_dtype = x_nchw.dtype

    # Token tile: multiple of 128 lanes, capped by the requested size and by
    # the (128-rounded) spatial extent.  Pad tokens to a tile multiple.
    tile_t = max(128, min(_round_up(tile_tokens, 128), _round_up(HW, 128)))
    HW_p = _round_up(HW, tile_t)

    wdt = weight_dtype if weight_dtype is not None else x_nchw.dtype

    # NCHW -> (N, C, H*W): free reshape, channels stay on the contraction axis.
    x3 = x_nchw.reshape(N, C, HW)
    if HW_p != HW:
        x3 = jnp.pad(x3, ((0, 0), (0, 0), (0, HW_p - HW)))
    x3 = x3.astype(wdt)

    # Fuse the two gate projections into one wide operand.
    wab = jnp.concatenate(
        [wa.reshape(hidden, C), wb.reshape(hidden, C)], axis=0).astype(wdt)
    bab = jnp.concatenate([ba, bb], axis=0).reshape(2 * hidden, 1)
    bab = bab.astype(jnp.float32)
    wc_m = wc.reshape(C, hidden).astype(wdt)
    bc_m = bc.reshape(C, 1).astype(jnp.float32)

    grid = (N, HW_p // tile_t)

    out3 = pl.pallas_call(
        _reglu_kernel,
        out_shape=jax.ShapeDtypeStruct((N, C, HW_p), out_dtype),
        grid_spec=pltpu.PrefetchScalarGridSpec(
            num_scalar_prefetch=0,
            grid=grid,
            in_specs=[
                pl.BlockSpec((1, C, tile_t), lambda n, t: (n, 0, t)),   # x tile
                pl.BlockSpec((2 * hidden, C), lambda n, t: (0, 0)),     # [Wa;Wb]
                pl.BlockSpec((2 * hidden, 1), lambda n, t: (0, 0)),     # [ba;bb]
                pl.BlockSpec((C, hidden), lambda n, t: (0, 0)),         # Wc
                pl.BlockSpec((C, 1), lambda n, t: (0, 0)),              # bc
            ],
            out_specs=pl.BlockSpec((1, C, tile_t), lambda n, t: (n, 0, t)),
        ),
        compiler_params=pltpu.CompilerParams(
            dimension_semantics=("parallel", "parallel"),
            vmem_limit_bytes=64 * 1024 * 1024,
        ),
    )(x3, wab, bab, wc_m, bc_m)

    # Strip token padding and restore NCHW (free reshape).
    return out3[:, :, :HW].reshape(N, C, H, W)


def _init_params(key, channels, ffn_mul):
    """Deterministic synthetic init mimicking Conv2d parameter shapes."""
    hidden = channels * ffn_mul
    ks = jax.random.split(key, 6)
    s_in = 1.0 / jnp.sqrt(channels)
    s_hid = 1.0 / jnp.sqrt(hidden)
    wa = jax.random.uniform(ks[0], (hidden, channels, 1, 1), jnp.float32, -s_in, s_in)
    ba = jax.random.uniform(ks[1], (hidden,), jnp.float32, -s_in, s_in)
    wb = jax.random.uniform(ks[2], (hidden, channels, 1, 1), jnp.float32, -s_in, s_in)
    bb = jax.random.uniform(ks[3], (hidden,), jnp.float32, -s_in, s_in)
    wc = jax.random.uniform(ks[4], (channels, hidden, 1, 1), jnp.float32, -s_hid, s_hid)
    bc = jax.random.uniform(ks[5], (channels,), jnp.float32, -s_hid, s_hid)
    return wa, ba, wb, bb, wc, bc


def _reference(x, wa, ba, wb, bb, wc, bc):
    """Pure-JAX reference of the PyTorch forward (1x1 convs as matmuls)."""
    N, C, H, W = x.shape
    hidden = wa.shape[0]
    x2d = jnp.transpose(x, (0, 2, 3, 1)).reshape(-1, C)
    a = x2d @ wa.reshape(hidden, C).T + ba
    b = x2d @ wb.reshape(hidden, C).T + bb
    y = (a * jnp.maximum(b, 0.0)) @ wc.reshape(C, hidden).T + bc
    return jnp.transpose(y.reshape(N, H, W, C), (0, 3, 1, 2))


if __name__ == "__main__":
    key = jax.random.PRNGKey(0)
    kx, kp = jax.random.split(key)

    channels, ffn_mul = 4, 4
    N, H, W = 2, 16, 16
    x = jax.random.normal(kx, (N, channels, H, W), jnp.float32)

    wa, ba, wb, bb, wc, bc = _init_params(kp, channels, ffn_mul)
    ref = _reference(x, wa, ba, wb, bb, wc, bc)

    # f32 path: bit-for-bit-ish vs. the f32 reference.
    out = reglu_forward(x, wa, ba, wb, bb, wc, bc)
    out = jax.block_until_ready(out)
    assert out.shape == (N, channels, H, W)
    assert jnp.allclose(out, ref, atol=1e-5, rtol=1e-5)

    # bf16 operand path (halved HBM/VMEM traffic); looser tolerance.
    out_bf16 = reglu_forward(x, wa, ba, wb, bb, wc, bc,
                             weight_dtype=jnp.bfloat16)
    out_bf16 = jax.block_until_ready(out_bf16)
    assert out_bf16.shape == (N, channels, H, W)
    assert jnp.allclose(out_bf16.astype(jnp.float32), ref, atol=1e-1, rtol=5e-2)

    print("KERNEL_OK")
</pallas_src>

<mosaic_0001>
module attributes {stable_mosaic.version = 11 : i64} {
  func.func @_reglu_kernel(%arg0: i32, %arg1: i32, %arg2: memref<1x4x256xf32, #tpu.memory_space<vmem>>, %arg3: memref<32x4xf32, #tpu.memory_space<vmem>>, %arg4: memref<32x1xf32, #tpu.memory_space<vmem>>, %arg5: memref<4x16xf32, #tpu.memory_space<vmem>>, %arg6: memref<4x1xf32, #tpu.memory_space<vmem>>, %arg7: memref<1x4x256xf32, #tpu.memory_space<vmem>>) attributes {dimension_semantics = [#tpu.dimension_semantics<parallel>, #tpu.dimension_semantics<parallel>], iteration_bounds = array<i64: 2, 1>, scalar_prefetch = 0 : i64, scratch_operands = 0 : i64, tpu.core_type = #tpu.core_type<tc>, window_params = [{transform_indices = @transform_0, window_bounds = array<i64: 1, 4, 256>}, {pipeline_mode = #tpu.pipeline_mode<synchronous>, transform_indices = @transform_1, window_bounds = array<i64: 32, 4>}, {pipeline_mode = #tpu.pipeline_mode<synchronous>, transform_indices = @transform_2, window_bounds = array<i64: 32, 1>}, {pipeline_mode = #tpu.pipeline_mode<synchronous>, transform_indices = @transform_3, window_bounds = array<i64: 4, 16>}, {pipeline_mode = #tpu.pipeline_mode<synchronous>, transform_indices = @transform_4, window_bounds = array<i64: 4, 1>}, {transform_indices = @transform_5, window_bounds = array<i64: 1, 4, 256>}]} {
    %c0 = arith.constant 0 : index
    %c0_0 = arith.constant 0 : index
    %c0_1 = arith.constant 0 : index
    %0 = vector.load %arg2[%c0, %c0_0, %c0_1] : memref<1x4x256xf32, #tpu.memory_space<vmem>>, vector<1x4x256xf32>
    %1 = vector.shape_cast %0 : vector<1x4x256xf32> to vector<4x256xf32>
    %c0_2 = arith.constant 0 : index
    %c0_3 = arith.constant 0 : index
    %2 = vector.load %arg3[%c0_2, %c0_3] : memref<32x4xf32, #tpu.memory_space<vmem>>, vector<32x4xf32>
    %cst = arith.constant dense<0.000000e+00> : vector<32x256xf32>
    %3 = tpu.matmul %2, %1, %cst {dimension_numbers = #tpu.dot_dimension_numbers<[1], [0], [0], [1], [0, 0, 1, 1], [], []>} : vector<32x4xf32>, vector<4x256xf32>, vector<32x256xf32> -> vector<32x256xf32>
    %c0_4 = arith.constant 0 : index
    %c0_5 = arith.constant 0 : index
    %4 = vector.load %arg4[%c0_4, %c0_5] : memref<32x1xf32, #tpu.memory_space<vmem>>, vector<32x1xf32>
    %5 = vector.broadcast %4 : vector<32x1xf32> to vector<32x256xf32>
    %6 = arith.addf %3, %5 : vector<32x256xf32>
    %7 = vector.extract_strided_slice %6 {offsets = [0, 0], sizes = [16, 256], strides = [1, 1]} : vector<32x256xf32> to vector<16x256xf32>
    %8 = vector.extract_strided_slice %6 {offsets = [16, 0], sizes = [16, 256], strides = [1, 1]} : vector<32x256xf32> to vector<16x256xf32>
    %cst_6 = arith.constant 0.000000e+00 : f32
    %9 = vector.broadcast %cst_6 : f32 to vector<16x256xf32>
    %10 = arith.maximumf %8, %9 : vector<16x256xf32>
    %11 = arith.mulf %7, %10 : vector<16x256xf32>
    %c0_7 = arith.constant 0 : index
    %c0_8 = arith.constant 0 : index
    %12 = vector.load %arg5[%c0_7, %c0_8] : memref<4x16xf32, #tpu.memory_space<vmem>>, vector<4x16xf32>
    %cst_9 = arith.constant dense<0.000000e+00> : vector<4x256xf32>
    %13 = tpu.matmul %12, %11, %cst_9 {dimension_numbers = #tpu.dot_dimension_numbers<[1], [0], [0], [1], [0, 0, 1, 1], [], []>} : vector<4x16xf32>, vector<16x256xf32>, vector<4x256xf32> -> vector<4x256xf32>
    %c0_10 = arith.constant 0 : index
    %c0_11 = arith.constant 0 : index
    %14 = vector.load %arg6[%c0_10, %c0_11] : memref<4x1xf32, #tpu.memory_space<vmem>>, vector<4x1xf32>
    %15 = vector.broadcast %14 : vector<4x1xf32> to vector<4x256xf32>
    %16 = arith.addf %13, %15 : vector<4x256xf32>
    %c0_12 = arith.constant 0 : index
    %c0_13 = arith.constant 0 : index
    %c0_14 = arith.constant 0 : index
    %17 = vector.load %arg7[%c0_12, %c0_13, %c0_14] : memref<1x4x256xf32, #tpu.memory_space<vmem>>, vector<1x4x256xf32>
    %18 = vector.shape_cast %17 : vector<1x4x256xf32> to vector<4x256xf32>
    %19 = vector.shape_cast %16 : vector<4x256xf32> to vector<1x4x256xf32>
    tpu.vector_store %arg7[%c0_12, %c0_13, %c0_14], %19 {strides = array<i32>} : memref<1x4x256xf32, #tpu.memory_space<vmem>>, vector<1x4x256xf32>,
    return
  }
  func.func @transform_0(%arg0: i32, %arg1: i32) -> (i32, i32, i32) {
    %c0_i32 = arith.constant 0 : i32
    %c0_i32_0 = arith.constant 0 : i32
    return %arg0, %c0_i32, %arg1 : i32, i32, i32
  }
  func.func @transform_1(%arg0: i32, %arg1: i32) -> (i32, i32) {
    %c0_i32 = arith.constant 0 : i32
    %c0_i32_0 = arith.constant 0 : i32
    %c0_i32_1 = arith.constant 0 : i32
    return %c0_i32, %c0_i32_0 : i32, i32
  }
  func.func @transform_2(%arg0: i32, %arg1: i32) -> (i32, i32) {
    %c0_i32 = arith.constant 0 : i32
    %c0_i32_0 = arith.constant 0 : i32
    %c0_i32_1 = arith.constant 0 : i32
    return %c0_i32, %c0_i32_0 : i32, i32
  }
  func.func @transform_3(%arg0: i32, %arg1: i32) -> (i32, i32) {
    %c0_i32 = arith.constant 0 : i32
    %c0_i32_0 = arith.constant 0 : i32
    %c0_i32_1 = arith.constant 0 : i32
    return %c0_i32, %c0_i32_0 : i32, i32
  }
  func.func @transform_4(%arg0: i32, %arg1: i32) -> (i32, i32) {
    %c0_i32 = arith.constant 0 : i32
    %c0_i32_0 = arith.constant 0 : i32
    %c0_i32_1 = arith.constant 0 : i32
    return %c0_i32, %c0_i32_0 : i32, i32
  }
  func.func @transform_5(%arg0: i32, %arg1: i32) -> (i32, i32, i32) {
    %c0_i32 = arith.constant 0 : i32
    %c0_i32_0 = arith.constant 0 : i32
    return %arg0, %c0_i32, %arg1 : i32, i32, i32
  }
}

</mosaic_0001>

<bundles_post_ra>
// kernel: tpu_custom_call.1
= control target key start
LH: loop header
LB: loop body
LE: loop exit
PB: predicated region body
PF: predicated region fallthrough
CT: control target
= control target key end

     0   :  { %10 = vsyncpa [#allocation3], 0  ;;  %s1418_s0 = inlined_call_operand.hbm [shape: f32[2,4,256], index: 0, kind: input, shape index: {}]   ;;  %s1419_s1 = inlined_call_operand.hbm [shape: f32[32,4], index: 1, kind: input, shape index: {}]   ;;  %s1420_s2 = inlined_call_operand.hbm [shape: f32[32,1], index: 2, kind: input, shape index: {}]   ;;  %s1421_s3 = inlined_call_operand.hbm [shape: f32[4,16], index: 3, kind: input, shape index: {}]   ;;  %s1422_s4 = inlined_call_operand.hbm [shape: f32[4,1], index: 4, kind: input, shape index: {}]   ;;  %s1423_s5 = inlined_call_operand.hbm [shape: f32[2,4,256], index: 5, kind: output, shape index: {}]  }
   0x1   :  { %12 = vsyncpa [#allocation3 + $0x1], 0 }
   0x2   :  { %13 = vsyncpa [#allocation6], 0 }
   0x3   :  { %14 = vsyncpa [#allocation9], 0 }
   0x4   :  { %15 = vsyncpa [#allocation4], 0 }
   0x5   :  { %17 = vsyncpa [#allocation4 + $0x1], 0  ;;  %s1109_s18 = smov 0   ;;  %s1111_s19 = smov 0  }
   0x6   :  { %s1113_s20 = smov 0   ;;  %s1115_s21 = smov 0  }
   0x7   :  { %s1117_s22 = smov 0   ;;  %s1119_s23 = smov 0  }
   0x8 LB: > { %s687_s24 = sadd.s32 4294967295, %s1067_s23   ;;  %p689_p0 = scmp.ge.s32.totalorder %s1067_s23, 1  ;;  %s1067_s23 = sphi %s1119_s23, %s23_s23   ;;  %s1063_s22 = sphi %s1117_s22, %s1447_s22   ;;  %s1059_s21 = sphi %s1115_s21, %s1446_s21   ;;  %s1055_s20 = sphi %s1113_s20, %s1445_s20   ;;  %s1051_s19 = sphi %s1111_s19, %s1444_s19   ;;  %s1047_s18 = sphi %s1109_s18, %s1443_s18  }
   0x9   : > { %p1143_p1 = scmp.eq.s32.totalorder %s687_s24, 0  ;;  %p180_p2 = scmp.lt.s32.totalorder %s1067_s23, 3 }
   0xa   : > { %s1069_s27 = smov [#allocation5]   ;;  %s1070_s30 = smov [#allocation8]  }
   0xb   : > { %s1428_s25 = scalar_select %p1143_p1, 1, 0 }
   0xc   : > { %p1148_p3 = pnand %p689_p0, %p180_p2  ;;  %s192_s28 = sshll.u32 %s1069_s27, 4  ;;  %s1152_s28 = int_to_ptr.vmem [resolvable:$true] %s192_s28 }
   0xd   : > { %s219_s6 = sshll.u32 %s1070_s30, 4  ;;  %s1071_s7 = smov [#allocation7]   ;;  %s1163_s6 = int_to_ptr.vmem [resolvable:$true] %s219_s6 }
   0xe   : > { %s1429_s26 = scalar_select %p1148_p3, 1, 0 }
   0xf   : > { %p745_p4 = pneg %p1148_p3  ;;  %s1165_s8 = sshll.u32 %s1071_s7, 4  ;;  %s206_s8 = int_to_ptr.vmem [resolvable:$true] %s1165_s8 }
  0x10   : > { %s835_s11 = scalar_lea.hbm %s1419_s1, 512 }
  0x11   : > { %p1159_p6 = pnand %p745_p4, %p1143_p1  ;;  %p836_p7 = scmp.ne.s32.totalorder %s1419_s1, %s835_s11 }
  0x12   : > { %p842_p11 = scmp.lt.u32.totalorder %s835_s11, %s1419_s1 }
  0x13   : > { %p1175_p8 = pneg %p1159_p6 }
  0x15   : > { %p838_p9 = pnand %p1175_p8, %p836_p7 }
  0x17   : > { %p839_p10 = pneg %p838_p9 }
  0x19   : > { %p844_p12 = pnand %p842_p11, %p839_p10 }
  0x1b   : > { %847 = shalt.err (!%p844_p12)
}
  0x1c   : > { %s848_s17 = scalar_lea.vmem %s1152_s28, 512  ;;  %p856_p4 = scmp.lt.s32.totalorder %s1152_s28, %s1152_s28 }
  0x1d   : > { %p849_p13 = scmp.ne.s32.totalorder %s1152_s28, %s848_s17  ;;  %p857_p5 = scmp.lt.s32.totalorder %s848_s17, %s848_s17 }
  0x1f   : > { %p851_p0 = pnand %p849_p13, %p1175_p8  ;;  %p858_p7 = por %p857_p5, %p856_p4 }
  0x21   : > { %p852_p2 = pneg %p851_p0 }
  0x23   : > { %p859_p9 = pnand %p858_p7, %p852_p2 }
  0x25   : > { %862 = shalt.err (!%p859_p9)
}
  0x26   : > { %s1072_s27 = smov 128   ;;  %s1073_s30 = smov 8  }
  0x27   : > { %748 = dma.hbm_to_vmem [thread:$0]  (!%p1159_p6), %s1419_s1, 512, %s1152_s28, [#allocation6], %s1072_s27, %s1072_s27, %s1073_s30  }
  0x28   : > { %s863_s12 = scalar_lea.hbm %s1421_s3, 64 }
  0x29   : > { %p864_p5 = scmp.ne.s32.totalorder %s1421_s3, %s863_s12  ;;  %p870_p12 = scmp.lt.u32.totalorder %s863_s12, %s1421_s3 }
  0x2b   : > { %p866_p10 = pnand %p864_p5, %p1175_p8 }
  0x2d   : > { %p867_p11 = pneg %p866_p10 }
  0x2f   : > { %p872_p13 = pnand %p870_p12, %p867_p11 }
  0x31   : > { %875 = shalt.err (!%p872_p13)
}
  0x32   : > { %s876_s28 = scalar_lea.vmem %s1163_s6, 64  ;;  %p884_p7 = scmp.lt.s32.totalorder %s1163_s6, %s1163_s6 }
  0x33   : > { %p877_p0 = scmp.ne.s32.totalorder %s1163_s6, %s876_s28  ;;  %p885_p9 = scmp.lt.s32.totalorder %s876_s28, %s876_s28 }
  0x35   : > { %p879_p2 = pnand %p877_p0, %p1175_p8  ;;  %p886_p5 = por %p885_p9, %p884_p7 }
  0x37   : > { %p880_p4 = pneg %p879_p2 }
  0x39   : > { %p887_p10 = pnand %p886_p5, %p880_p4 }
  0x3b   : > { %890 = shalt.err (!%p887_p10)
}
  0x3c   : > { %754 = dma.hbm_to_vmem [thread:$0]  (!%p1159_p6), %s1421_s3, 64, %s1163_s6, [#allocation9]  }
  0x3d   : > { %s891_s12 = scalar_lea.hbm %s1420_s2, 512 }
  0x3e   : > { %p892_p11 = scmp.ne.s32.totalorder %s1420_s2, %s891_s12  ;;  %p898_p0 = scmp.lt.u32.totalorder %s891_s12, %s1420_s2 }
  0x40   : > { %p894_p12 = pnand %p892_p11, %p1175_p8 }
  0x42   : > { %p895_p13 = pneg %p894_p12 }
  0x44   : > { %p900_p2 = pnand %p898_p0, %p895_p13 }
  0x46   : > { %903 = shalt.err (!%p900_p2)
}
  0x47   : > { %s904_s28 = scalar_lea.vmem %s206_s8, 512  ;;  %p912_p5 = scmp.lt.s32.totalorder %s206_s8, %s206_s8 }
  0x48   : > { %p905_p4 = scmp.ne.s32.totalorder %s206_s8, %s904_s28  ;;  %p913_p10 = scmp.lt.s32.totalorder %s904_s28, %s904_s28 }
  0x4a   : > { %p907_p7 = pnand %p905_p4, %p1175_p8  ;;  %p914_p3 = por %p913_p10, %p912_p5 }
  0x4c   : > { %p908_p9 = pneg %p907_p7 }
  0x4e   : > { %p915_p1 = pnand %p914_p3, %p908_p9 }
  0x50   : > { %918 = shalt.err (!%p915_p1)
}
  0x51   : > { %751 = dma.hbm_to_vmem [thread:$0]  (!%p1159_p6), %s1420_s2, 512, %s206_s8, [#allocation6], %s1072_s27, %s1072_s27, %s1073_s30  }
  0x52   : > { %s1074_s9 = smov [#allocation10]   ;;  %s919_s13 = scalar_lea.hbm %s1422_s4, 64 }
  0x53   : > { %s230_s10 = sshll.u32 %s1074_s9, 4  ;;  %p920_p1 = scmp.ne.s32.totalorder %s1422_s4, %s919_s13  ;;  %s231_s10 = int_to_ptr.vmem [resolvable:$true] %s230_s10 }
  0x54   : > { %p926_p12 = scmp.lt.u32.totalorder %s919_s13, %s1422_s4 }
  0x55   : > { %p922_p3 = pnand %p920_p1, %p1175_p8 }
  0x57   : > { %p923_p11 = pneg %p922_p3 }
  0x59   : > { %p928_p13 = pnand %p926_p12, %p923_p11 }
  0x5b   : > { %931 = shalt.err (!%p928_p13)
}
  0x5c   : > { %s932_s8 = scalar_lea.vmem %s231_s10, 64  ;;  %p940_p7 = scmp.lt.s32.totalorder %s231_s10, %s231_s10 }
  0x5d   : > { %p933_p0 = scmp.ne.s32.totalorder %s231_s10, %s932_s8  ;;  %p941_p9 = scmp.lt.s32.totalorder %s932_s8, %s932_s8 }
  0x5f   : > { %p935_p2 = pnand %p933_p0, %p1175_p8  ;;  %p942_p5 = por %p941_p9, %p940_p7 }
  0x61   : > { %p936_p4 = pneg %p935_p2 }
  0x63   : > { %p943_p10 = pnand %p942_p5, %p936_p4 }
  0x65   : > { %946 = shalt.err (!%p943_p10)
}
  0x66   : > { %757 = dma.hbm_to_vmem [thread:$0]  (!%p1159_p6), %s1422_s4, 64, %s231_s10, [#allocation9]  }
  0x67   : > { %s688_s14 = sadd.s32 4294967294, %s1067_s23   ;;  %s35_s6 = sadd.s32 1, %s1063_s22 }
  0x68   : > { %p37_p8 = scmp.ge.s32.totalorder %s35_s6, 2  ;;  %s44_s29 = sadd.s32 1, %s1055_s20 }
  0x69   : > { %p51_p1 = scmp.ne.s32.totalorder %s1055_s20, %s1051_s19  ;;  %p52_p3 = scmp.eq.s32.totalorder %s1067_s23, 0 }
  0x6a   : > { %s1449_s6 = smov (%p37_p8, %s35_s6), 0  ;;  %p57_p12 = scmp.ne.s32.totalorder %s1051_s19, %s1047_s18 }
  0x6b   : > { %p1270_p11 = por %p52_p3, %p51_p1  ;;  %s39_s9 = ssub.s32 %s1063_s22, %s1449_s6 }
  0x6c   : > { %p167_p6 = scmp.eq.s32.totalorder %s687_s24, 1  ;;  %p42_p13 = scmp.eq.s32.totalorder %s39_s9, 0 }
  0x6d   : > { %p1433_p0 = scmp.ne.s32.totalorder %s1428_s25, 0  ;;  %p173_p7 = scmp.eq.s32.totalorder %s688_s14, 1 }
  0x6e   : > { %p1286_p4 = por %p167_p6, %p51_p1  ;;  %p770_p5 = scmp.lt.s32.totalorder %s1067_s23, 2 }
  0x6f   : > { %p1282_p2 = por %p1433_p0, %p57_p12  ;;  %p1293_p9 = por %p173_p7, %p57_p12 }
  0x70   : > { %s1435_s11 = scalar_select %p1286_p4, 1, 0 }
  0x71   : > { %s1291_s12 = scalar_select %p42_p13, %s1055_s20, %s44_s29  }
  0x72   : > { %s1436_s13 = scalar_select %p1293_p9, 1, 0 }
  0x73   : > { %s241_s15 = sand.u32 1, %s1055_s20   ;;  %s717_s24 = sshll.u32 %s1063_s22, 7 }
  0x74   : > { %s695_s16 = sshll.u32 %s241_s15, 3  ;;  %s1303_s8 = scalar_lea.hbm %s1418_s0, %s717_s24 }
  0x75   : > { %s245_s27 = scalar_lea.vmem [#allocation2], %s695_s16  ;;  %p1307_p10 = pnand %p770_p5, %p1270_p11 }
  0x76   : > { %s255_s30 = sshll.u32 %s245_s27, 4  ;;  %s242_s29 = scalar_lea.sflag [#allocation3], %s241_s15  ;;  %s1311_s30 = int_to_ptr.vmem [resolvable:$true] %s255_s30 }
  0x77   : > { %s947_s9 = scalar_lea.hbm %s1303_s8, 128  ;;  %p949_p1 = pneg %p1307_p10 }
  0x78   : > { %p948_p8 = scmp.ne.s32.totalorder %s1303_s8, %s947_s9  ;;  %s952_s7 = scalar_lea.hbm %s1418_s0, 256 }
  0x79   : > { %p953_p11 = scmp.lt.u32.totalorder %s1303_s8, %s1418_s0  ;;  %p954_p6 = scmp.lt.u32.totalorder %s952_s7, %s947_s9 }
  0x7a   : > { %p950_p3 = pnand %p949_p1, %p948_p8  ;;  %p956_p0 = scmp.lt.u32.totalorder %s947_s9, %s1303_s8 }
  0x7b   : > { %p955_p13 = por %p954_p6, %p953_p11 }
  0x7c   : > { %p951_p12 = pneg %p950_p3 }
  0x7d   : > { %p957_p7 = por %p956_p0, %p955_p13 }
  0x7f   : > { %p958_p5 = pnand %p957_p7, %p951_p12 }
  0x81   : > { %961 = shalt.err (!%p958_p5)
}
  0x82   : > { %s962_s15 = scalar_lea.vmem %s1311_s30, 128  ;;  %s1075_s27 = smov [#allocation2]  }
  0x83   : > { %p963_p8 = scmp.ne.s32.totalorder %s1311_s30, %s962_s15  ;;  %s967_s24 = sshll.u32 %s1075_s27, 4  ;;  %s968_s24 = int_to_ptr.vmem [resolvable:$false] %s967_s24 }
  0x84   : > { %s969_s16 = scalar_lea.vmem %s968_s24, 256  ;;  %p970_p4 = scmp.lt.s32.totalorder %s1311_s30, %s968_s24 }
  0x85   : > { %p965_p3 = pnand %p963_p8, %p949_p1  ;;  %p971_p11 = scmp.lt.s32.totalorder %s969_s16, %s962_s15 }
  0x87   : > { %p966_p9 = pneg %p965_p3  ;;  %p972_p6 = por %p971_p11, %p970_p4 }
  0x89   : > { %p973_p13 = pnand %p972_p6, %p966_p9 }
  0x8b   : > { %976 = shalt.err (!%p973_p13)
}
  0x8c   : > { %761 = dma.hbm_to_vmem [thread:$0]  (!%p1307_p10), %s1303_s8, 128, %s1311_s30, %s242_s29  }
  0x8d   : > { %p1438_p12 = scmp.ne.s32.totalorder %s1429_s26, 0 }
  0x8e   : > { %s1341_s9 = sand.u32 (!%p1438_p12), 1, %s1051_s19  }
  0x8f   : > { %264 = sbr.rel (%p1438_p12) target bundleno = 625 (0x271), region = 40  ;;  %s699_s7 = sshll.u32 (!%p1438_p12), %s1341_s9, 3 }
  0x90   : > { %s267_s17 = scalar_lea.sflag (!%p1438_p12), [#allocation3], %s1341_s9  ;;  %s270_s28 = scalar_lea.vmem (!%p1438_p12), [#allocation2], %s699_s7 }
  0x96   : > { %1030 = dma.done.wait (%p1282_p2), %s267_s17, 128  }
  0x97   : > { %1032 = vsyncadd (%p1282_p2), %s267_s17, 4294967168  ;;  %p1439_p4 = scmp.ne.s32.totalorder %s1428_s25, 0 }
  0x99   : > { %1034 = dma.done.wait (%p1439_p4), [#allocation6], 1024  }
  0x9a   : > { %1036 = vsyncadd (%p1439_p4), [#allocation6], 4294966272 }
  0x9b   : > { %1038 = dma.done.wait (%p1439_p4), [#allocation9], 128  }
  0x9c   : > { %1040 = vsyncadd (%p1439_p4), [#allocation9], 4294967168  ;;  %v1076_v0 = vmov 0.0   ;;  %v1077_v1 = vmov 0   ;;  %v315_v2 = vld [vmem:[%s270_s28] sm:$0xff]  ;;  %vm359_vm0 = vcmask 1043456  }
  0x9d   : > { %428 = vmatprep.mubr.f32.mxu0 %v1076_v0  ;;  %446 = vmatprep.mubr.f32.mxu1 %v1076_v0  ;;  %v345_v3 = vcombine.high %v315_v2, %v315_v2  ;;  %v322_v4 = vld [vmem:[#allocation7 + $0x10] sm:$0xff]  ;;  %v316_v5 = vld [vmem:[#allocation5] sm:$0xff]  ;;  %vm346_vm1 = vcmask 31744   ;;  %v319_v6 = vld [vmem:[#allocation5 + $0x18] sm:$0xff]  ;;  %vm468_vm2 = vcmask 130048   ;;  %s718_s25 = sshll.u32 %s1059_s21, 7 }
  0x9e   : > { %832 = vset.pattern.permute.xlu0 %v1077_v1  ;;  %833 = vset.pattern.permute.xlu1 %v1077_v1  ;;  %v320_v7 = vld [vmem:[#allocation7] sm:$0xff]  ;;  %v323_v8 = vld [vmem:[#allocation7 + $0x18] sm:$0xff]  ;;  %v317_v9 = vld [vmem:[#allocation5 + $0x8] sm:$0xff]  ;;  %s312_s26 = scalar_lea.vmem [#allocation11], %s699_s7  ;;  %s1369_s14 = scalar_lea.hbm %s1423_s5, %s718_s25 }
  0x9f   : > { %336 = vperm.xlu0 %832, %v322_v4   ;;  %705 = vmatprep.subr.msk.mxu0 %vm359_vm0, %v345_v3  ;;  %v321_v10 = vld [vmem:[#allocation7 + $0x8] sm:$0xff]  ;;  %v462_v11 = vld [vmem:[#allocation10] sm:$0xf]  ;;  %v318_v12 = vld [vmem:[#allocation5 + $0x10] sm:$0xff]  ;;  %s565_s10 = sshll.u32 %s312_s26, 4  ;;  %s549_s29 = scalar_lea.sflag [#allocation4], %s1341_s9  ;;  %s1371_s10 = int_to_ptr.vmem [resolvable:$true] %s565_s10 }
  0xa0   : > { %723 = vmatprep.subr.msk.mxu1 %vm359_vm0, %v345_v3  ;;  %706 = vmatpush1.msk.msra.mxu0 %vm359_vm0, %v315_v2  ;;  %v461_v43 = vld [vmem:[#allocation8] sm:$0xf]  ;;  %s977_s15 = scalar_lea.vmem %s1371_s10, 128  ;;  %p1440_p9 = scmp.ne.s32.totalorder %s1435_s11, 0 }
  0xa1   : > { %724 = vmatpush1.msk.msra.mxu1 %vm359_vm0, %v315_v2  ;;  %707 = vmatmul.mubr.msk.f32.vlgmr.msra.gmra.mrb[0].mxu0 %vm346_vm1, %v316_v5  ;;  %p978_p2 = scmp.ne.s32.totalorder %s1371_s10, %s977_s15  ;;  %s1078_s21 = smov [#allocation11]  }
  0xa2   : > { %710 = vmatmul.mubr.msk.f32.vlgmr.msra.gmra.mrb[0].mxu1 %vm346_vm1, %v319_v6  ;;  %434 = vmatprep.mubr.f32.mxu0 %v1076_v0  ;;  %s981_s27 = sshll.u32 %s1078_s21, 4  ;;  %s982_s27 = int_to_ptr.vmem [resolvable:$false] %s981_s27 }
  0xa3   : > { %326 = vperm.xlu1 %833, %v320_v7   ;;  %341 = vperm.xlu0 %832, %v323_v8   ;;  %p979_p10 = pnand %p978_p2, %p1440_p9  ;;  %s983_s24 = scalar_lea.vmem %s982_s27, 256 }
  0xa4   : > { %536 = vmatprep.mubr.f32.mxu1 %v1076_v0  ;;  %p984_p0 = scmp.lt.s32.totalorder %s1371_s10, %s982_s27  ;;  %p985_p7 = scmp.lt.s32.totalorder %s983_s24, %s977_s15 }
  0xa5   : > { %708 = vmatmul.mubr.msk.f32.gmra.mrb[2].mxu0 %vm346_vm1, %v317_v9  ;;  %p980_p1 = pneg %p979_p10 }
  0xa6   : > { %440 = vmatprep.mubr.f32.mxu0 %v1076_v0  ;;  %p986_p5 = por %p985_p7, %p984_p0 }
  0xa7   : > { %331 = vperm.xlu1 %833, %v321_v10   ;;  %465 = vperm.xlu0 %832, %v462_v11  }
  0xa8   : > { %p987_p8 = pnand %p986_p5, %p980_p1 }
  0xa9   : > { %709 = vmatmul.mubr.msk.f32.gmra.mrb[4].mxu0 %vm346_vm1, %v318_v12 }
 0x11e   : > { %v337_v13 = vpop.permute.xlu0 %336 }
 0x122   : > { %v327_v14 = vpop.permute.xlu1 %326  ;;  %v342_v15 = vpop.permute.xlu0 %341 }
 0x126   : > { %v332_v22 = vpop.permute.xlu1 %331  ;;  %v466_v44 = vpop.permute.xlu0 %465 }
 0x174   : > { %v430_v16 = vpop.f32.mrb[0].mxu0 }
 0x175   : > { %v448_v17 = vpop.f32.mrb[0].mxu1  ;;  %v432_v18 = vpop.f32.mrb[1].mxu0  ;;  %v431_v35 = vadd.f32 %v430_v16, %v327_v14 }
 0x176   : > { %v449_v19 = vadd.f32 %v448_v17, %v342_v15  ;;  %v450_v20 = vpop.f32.mrb[1].mxu1  ;;  %v433_v37 = vadd.f32 %v432_v18, %v327_v14 }
 0x177   : > { %v451_v21 = vadd.f32 %v450_v20, %v342_v15 }
 0x178   : > { %v455_v23 = vmax.f32 %v449_v19, 0.0  ;;  %v436_v25 = vpop.f32.mrb[2].mxu0 }
 0x179   : > { %v456_v24 = vmax.f32 %v451_v21, 0.0  ;;  %v437_v26 = vadd.f32 %v436_v25, %v332_v22  ;;  %v438_v27 = vpop.f32.mrb[3].mxu0 }
 0x17a   : > { %v439_v28 = vadd.f32 %v438_v27, %v332_v22 }
 0x17b   : > { %v459_v29 = vmul.f32 %v455_v23, %v437_v26 }
 0x17c   : > { %v460_v30 = vmul.f32 %v456_v24, %v439_v28  ;;  %v442_v31 = vpop.f32.mrb[4].mxu0 }
 0x17d   : > { %v443_v32 = vadd.f32 %v442_v31, %v337_v13  ;;  %v444_v33 = vpop.f32.mrb[5].mxu0 }
 0x17e   : > { %v445_v34 = vadd.f32 %v444_v33, %v337_v13 }
 0x17f   : > { %v453_v36 = vmax.f32 %v443_v32, 0.0 }
 0x180   : > { %v454_v38 = vmax.f32 %v445_v34, 0.0 }
 0x181   : > { %v457_v39 = vmul.f32 %v453_v36, %v431_v35 }
 0x182   : > { %v458_v40 = vmul.f32 %v454_v38, %v433_v37 }
 0x183   : > { %v721_v41 = vpack.c.bf16 %v459_v29, %v457_v39 }
 0x184   : > { %v719_v42 = vpack.c.bf16 %v460_v30, %v458_v40 }
 0x186   : > { %720 = vmatprep.subr.bf16.mxu1 %v719_v42 }
 0x187   : > { %722 = vmatpush1.bf16.msra.mxu1 %v721_v41 }
 0x18a   : > { %711 = vmatmul.mubr.msk.f32.vlgmr.msra.gmra.mrb[2].mxu1 %vm468_vm2, %v461_v43 }
 0x25d   : > { %v538_v45 = vpop.f32.mrb[2].mxu1 }
 0x25e   : > { %v539_v46 = vadd.f32 %v538_v45, %v466_v44  ;;  %v540_v47 = vpop.f32.mrb[3].mxu1 }
 0x25f   : > { %v541_v48 = vadd.f32 %v540_v47, %v466_v44 }
 0x261   : > { %v545_v49 = vcombine.low %v539_v46, %v541_v48 }
 0x263   : > { %547 = vst [vmem:[%s312_s26] sm:$0xff] %v545_v49 }
 0x264   : > { %990 = shalt.err (!%p987_p8)
}
 0x265   : > { %s991_s16 = scalar_lea.hbm %s1369_s14, 128  ;;  %s995_s17 = scalar_lea.hbm %s1423_s5, 256 }
 0x266   : > { %p992_p3 = scmp.ne.s32.totalorder %s1369_s14, %s991_s16  ;;  %p996_p13 = scmp.lt.u32.totalorder %s1369_s14, %s1423_s5 }
 0x267   : > { %p997_p12 = scmp.lt.u32.totalorder %s995_s17, %s991_s16  ;;  %p999_p2 = scmp.lt.u32.totalorder %s991_s16, %s1369_s14 }
 0x268   : > { %p993_p11 = pnand %p992_p3, %p1440_p9 }
 0x269   : > { %p998_p4 = por %p997_p12, %p996_p13 }
 0x26a   : > { %p994_p6 = pneg %p993_p11 }
 0x26b   : > { %p1000_p10 = por %p999_p2, %p998_p4 }
 0x26d   : > { %p1001_p1 = pnand %p1000_p10, %p994_p6 }
 0x26f   : > { %1004 = shalt.err (!%p1001_p1)
}
 0x270   : > { %743 = dma.vmem_to_hbm [thread:$0]  (%p1440_p9), %s1371_s10, 128, %s1369_s14, %s549_s29  }
 0x271 PF: > { %s577_s26 = sand.u32 1, %s1047_s18   ;;  %p1441_p0 = scmp.ne.s32.totalorder %s1436_s13, 0 }
 0x272   : > { %p1442_p7 = scmp.ge.s32.totalorder %s1067_s23, 2  ;;  %s578_s8 = scalar_lea.sflag [#allocation4], %s577_s26 }
 0x274   : > { %p763_p5 = pnand %p1442_p7, %p1441_p0 }
 0x276   : > { %1042 = dma.done.wait (!%p763_p5), %s578_s8, 128  }
 0x277   : > { %1044 = vsyncadd (!%p763_p5), %s578_s8, 4294967168  ;;  %s23_s23 = sadd.s32 1, %s1067_s23   ;;  %s1443_s18 = smov %s1051_s19 }
 0x278   : > { %p20_p8 = scmp.ge.s32.totalorder %s23_s23, 4   ;;  %s1444_s19 = smov %s1055_s20 }
 0x279   : > { %s1445_s20 = smov %s1291_s12  ;;  %s1446_s21 = smov %s1063_s22 }
 0x27a   : > { %s1447_s22 = smov %s1449_s6  ;;  %22 = sbr.rel (!%p20_p8) target bundleno = 8 (0x8), region = 101 }
 0x281   :  { %583 = vsyncpa [#allocation3], 1 }
 0x282   :  { %585 = vsyncpa [#allocation3 + $0x1], 1 }
 0x283   :  { %586 = vsyncpa [#allocation6], 1 }
 0x284   :  { %587 = vsyncpa [#allocation9], 1 }
 0x285   :  { %588 = vsyncpa [#allocation4], 1 }
 0x286   :  { %590 = vsyncpa [#allocation4 + $0x1], 1 }

</bundles_post_ra>
